<compile_context>
chip_gen: v6e
topology: v6e:2x2x1
jax: 0.10.0
libtpu: 0.0.40
codegen_flags: <defaults>
</compile_context>

<pallas_src>
import functools

import jax
import jax.numpy as jnp
import numpy as np
from jax.experimental import pallas as pl
from jax.experimental.pallas import tpu as pltpu

FLOPS = {
    'DiT-S/2':  dict(attn=0.201326592, mlp=0.301989888),
    'DiT-B/2':  dict(attn=0.704643072, mlp=1.207959552),
    'DiT-XL/2': dict(attn=1.50994944,  mlp=2.717908992),
}

_LANES = 128


def _round_up(x, m):
    return ((x + m - 1) // m) * m


def _dynamic_loss_kernel(attn_ref, mlp_ref, tok_ref,
                         attn_acc_ref, mlptok_acc_ref, clamp_acc_ref,
                         *, token_minimal):
    """Accumulates three partial sums for one (split, batch-tile) grid step.

    attn_ref : (TB,   L*Ca)  native dtype
    mlp_ref  : (TB*L, Cm)    native dtype
    tok_ref  : (TB*L, T)     native dtype
    *_acc_ref: (1, 1, 128) f32 output blocks, resident across the batch axis.
    """
    step = pl.program_id(1)

    @pl.when(step == 0)
    def _init():
        attn_acc_ref[...] = jnp.zeros_like(attn_acc_ref)
        mlptok_acc_ref[...] = jnp.zeros_like(mlptok_acc_ref)
        clamp_acc_ref[...] = jnp.zeros_like(clamp_acc_ref)

    # sum_{b,l,c} attn  — f32 accumulation without a materialized f32 tile.
    attn_partial = jnp.sum(attn_ref[...], dtype=jnp.float32)

    # sum_{b,l} (sum_c mlp[b,l,c]) * (sum_t tok[b,l,t])
    mlp_row = jnp.sum(mlp_ref[...], axis=1, keepdims=True, dtype=jnp.float32)
    tok_f = tok_ref[...].astype(jnp.float32)           # reused by clamp term
    tok_row = jnp.sum(tok_f, axis=1, keepdims=True)
    mlptok_partial = jnp.sum(mlp_row * tok_row)

    # sum_{b,l,t} max(token_minimal - tok, 0)
    clamp_partial = jnp.sum(
        jnp.maximum(jnp.float32(token_minimal) - tok_f, 0.0))

    # One vreg add per quantity per step (every lane holds the same value; the
    # cross-split combine + scalar math happen once in the wrapper).
    attn_acc_ref[...] += jnp.full(attn_acc_ref.shape, attn_partial, jnp.float32)
    mlptok_acc_ref[...] += jnp.full(mlptok_acc_ref.shape, mlptok_partial,
                                    jnp.float32)
    clamp_acc_ref[...] += jnp.full(clamp_acc_ref.shape, clamp_partial,
                                   jnp.float32)


def _vmem_limit_and_tile_budget():
    """Generation-aware scoped-VMEM limit & per-step (f32-accounted) budget."""
    try:
        cap = int(pltpu.get_tpu_info().vmem_capacity_bytes)
    except Exception:
        cap = 64 * 1024 * 1024            # conservative (v7x per-core VMEM)
    vmem_limit = min(int(cap * 0.75), 64 * 1024 * 1024)   # 48 MiB on v7x, 64 MiB on v5e/v6e
    tile_budget = min(12 * 1024 * 1024, vmem_limit // 4)
    return vmem_limit, tile_budget


def dynamic_loss(attn_channel_mask, mlp_channel_mask, token_select, *,
                 token_target_ratio=0.5, token_loss_ratio=2.0,
                 token_minimal=0.1, token_minimal_weight=1.0,
                 model_name='DiT-S/2', model_depth=4,
                 batch_tile=None, num_splits=2):
    """Pallas equivalent of DynamicLoss.forward. Returns (loss, real_activate_rate)."""
    attn_flops_c = FLOPS[model_name]['attn']
    mlp_flops_c = FLOPS[model_name]['mlp']
    orig_total = (attn_flops_c + mlp_flops_c) * model_depth

    b, l, c_attn = attn_channel_mask.shape
    _, _, c_mlp = mlp_channel_mask.shape
    _, _, n_tok, _ = token_select.shape
    assert l == model_depth, "layer dimension must match model_depth"

    vmem_limit, tile_budget = _vmem_limit_and_tile_budget()

    # Lane/sublane-dense 2-D folds (contiguous row-major reshapes, ~free).
    attn2 = attn_channel_mask.reshape(b, l * c_attn)
    mlp2 = mlp_channel_mask.reshape(b * l, c_mlp)
    tok2 = token_select.reshape(b * l, n_tok)

    # Batch tile: biggest multiple of 8 whose f32-accounted per-step footprint
    # fits the budget, capped so small batches are not over-padded.
    per_sample_f32 = 4 * l * (c_attn + c_mlp + n_tok)
    if batch_tile is None:
        batch_tile = max(8, (tile_budget // per_sample_f32) // 8 * 8)
        batch_tile = min(batch_tile, _round_up(pl.cdiv(b, num_splits), 8))
    batch_tile = _round_up(int(batch_tile), 8)

    tiles_per_split = pl.cdiv(b, num_splits * batch_tile)
    padded_b = num_splits * tiles_per_split * batch_tile
    pad_b = padded_b - b
    if pad_b:
        # Padding contributes exactly 0 to every partial sum: attn/mlp rows of
        # 0 sum to 0 (and zero out the mlp*token product); token rows of 1.0
        # make the clamp term max(token_minimal - 1, 0) = 0.
        attn2 = jnp.pad(attn2, ((0, pad_b), (0, 0)))
        mlp2 = jnp.pad(mlp2, ((0, pad_b * l), (0, 0)))
        tok2 = jnp.pad(tok2, ((0, pad_b * l), (0, 0)), constant_values=1.0)

    kernel = functools.partial(_dynamic_loss_kernel, token_minimal=token_minimal)

    acc_shape = jax.ShapeDtypeStruct((num_splits, 1, _LANES), jnp.float32)
    acc_spec = pl.BlockSpec((1, 1, _LANES), lambda c, i: (c, 0, 0))
    row_map = lambda c, i: (c * tiles_per_split + i, 0)

    attn_acc, mlptok_acc, clamp_acc = pl.pallas_call(
        kernel,
        out_shape=(acc_shape, acc_shape, acc_shape),
        grid_spec=pltpu.PrefetchScalarGridSpec(
            num_scalar_prefetch=0,
            grid=(num_splits, tiles_per_split),
            in_specs=[
                pl.BlockSpec((batch_tile, l * c_attn), row_map),
                pl.BlockSpec((batch_tile * l, c_mlp), row_map),
                pl.BlockSpec((batch_tile * l, n_tok), row_map),
            ],
            out_specs=(acc_spec, acc_spec, acc_spec),
        ),
        compiler_params=pltpu.CompilerParams(
            # Split axis uses both v7x TensorCores; batch axis accumulates.
            dimension_semantics=("parallel", "arbitrary"),
            vmem_limit_bytes=vmem_limit),
    )(attn2, mlp2, tok2)   # native dtypes; f32 accumulation happens in-kernel

    # Tiny scalar epilogue: combine per-split partial sums and finish the loss.
    attn_sum = jnp.sum(attn_acc[:, 0, 0])
    mlptok_sum = jnp.sum(mlptok_acc[:, 0, 0])
    clamp_sum = jnp.sum(clamp_acc[:, 0, 0])

    mean_total = (attn_flops_c / c_attn * attn_sum
                  + mlp_flops_c / (c_mlp * n_tok) * mlptok_sum) / (orig_total * b)
    token_loss = (mean_total - token_target_ratio) ** 2 \
        + token_minimal_weight * clamp_sum
    loss = token_loss_ratio * token_loss
    return loss, mean_total


def _reference(attn, mlp, tok_sel, *, token_target_ratio, token_loss_ratio,
               token_minimal, token_minimal_weight, model_name, model_depth):
    """Pure-JAX reference matching the PyTorch semantics."""
    attn_c = FLOPS[model_name]['attn']
    mlp_c = FLOPS[model_name]['mlp']
    orig = (attn_c + mlp_c) * model_depth
    mlp_flops = jnp.sum(
        (jnp.sum(mlp, axis=2) / mlp.shape[2])
        * (jnp.sum(jnp.squeeze(tok_sel, 3), axis=2) / tok_sel.shape[2]) * mlp_c,
        axis=1)
    attn_flops = jnp.sum(jnp.sum(attn, axis=2) / attn.shape[2] * attn_c, axis=1)
    total = (mlp_flops + attn_flops) / orig
    flops_loss = (jnp.mean(total) - token_target_ratio) ** 2
    tok_mean = jnp.mean(tok_sel, axis=-1)
    minimal_loss = jnp.sum(jnp.maximum(token_minimal - tok_mean, 0.0))
    token_loss = flops_loss + token_minimal_weight * minimal_loss
    return token_loss_ratio * token_loss, jnp.mean(total)


if __name__ == "__main__":
    # Small deterministic shapes; B deliberately not a multiple of the tile so
    # the padding + multi-step accumulation + both grid splits are exercised.
    B, L, C_ATTN, C_MLP, T = 20, 4, 8, 32, 16   # L == model_depth
    MODEL_NAME, MODEL_DEPTH = 'DiT-S/2', L

    key = jax.random.PRNGKey(0)
    k1, k2, k3 = jax.random.split(key, 3)
    attn_channel_mask = jax.random.uniform(k1, (B, L, C_ATTN), dtype=jnp.float32)
    mlp_channel_mask = jax.random.uniform(k2, (B, L, C_MLP), dtype=jnp.float32)
    token_select = jax.random.uniform(k3, (B, L, T, 1), dtype=jnp.float32)

    ref_loss, ref_rate = _reference(
        attn_channel_mask, mlp_channel_mask, token_select,
        token_target_ratio=0.5, token_loss_ratio=2.0,
        token_minimal=0.1, token_minimal_weight=1.0,
        model_name=MODEL_NAME, model_depth=MODEL_DEPTH)

    # (a) explicit small batch tile: pads 20 -> 32 samples, grid (2 splits, 2
    #     batch steps), exercises init/accumulate across steps on both splits.
    loss, rate = dynamic_loss(
        attn_channel_mask, mlp_channel_mask, token_select,
        model_name=MODEL_NAME, model_depth=MODEL_DEPTH, batch_tile=8)
    loss = jax.block_until_ready(loss)
    rate = jax.block_until_ready(rate)
    np.testing.assert_allclose(np.asarray(loss), np.asarray(ref_loss),
                               rtol=1e-5, atol=1e-5)
    np.testing.assert_allclose(np.asarray(rate), np.asarray(ref_rate),
                               rtol=1e-5, atol=1e-5)

    # (b) auto tile from the VMEM budget (single batch step per split).
    loss2, rate2 = dynamic_loss(
        attn_channel_mask, mlp_channel_mask, token_select,
        model_name=MODEL_NAME, model_depth=MODEL_DEPTH)
    loss2 = jax.block_until_ready(loss2)
    rate2 = jax.block_until_ready(rate2)
    np.testing.assert_allclose(np.asarray(loss2), np.asarray(ref_loss),
                               rtol=1e-5, atol=1e-5)
    np.testing.assert_allclose(np.asarray(rate2), np.asarray(ref_rate),
                               rtol=1e-5, atol=1e-5)

    print("KERNEL_OK")
</pallas_src>

<mosaic_0001>
module attributes {stable_mosaic.version = 11 : i64} {
  func.func @_dynamic_loss_kernel(%arg0: i32, %arg1: i32, %arg2: memref<8x32xf32, #tpu.memory_space<vmem>>, %arg3: memref<32x32xf32, #tpu.memory_space<vmem>>, %arg4: memref<32x16xf32, #tpu.memory_space<vmem>>, %arg5: memref<1x1x128xf32, #tpu.memory_space<vmem>>, %arg6: memref<1x1x128xf32, #tpu.memory_space<vmem>>, %arg7: memref<1x1x128xf32, #tpu.memory_space<vmem>>) attributes {dimension_semantics = [#tpu.dimension_semantics<parallel>, #tpu.dimension_semantics<arbitrary>], iteration_bounds = array<i64: 2, 2>, scalar_prefetch = 0 : i64, scratch_operands = 0 : i64, tpu.core_type = #tpu.core_type<tc>, window_params = [{transform_indices = @transform_0, window_bounds = array<i64: 8, 32>}, {transform_indices = @transform_1, window_bounds = array<i64: 32, 32>}, {transform_indices = @transform_2, window_bounds = array<i64: 32, 16>}, {transform_indices = @transform_3, window_bounds = array<i64: 1, 1, 128>}, {transform_indices = @transform_4, window_bounds = array<i64: 1, 1, 128>}, {transform_indices = @transform_5, window_bounds = array<i64: 1, 1, 128>}]} {
    %c0_i32 = arith.constant 0 : i32
    %0 = arith.cmpi eq, %arg1, %c0_i32 : i32
    %1 = arith.extui %0 : i1 to i32
    %c0_i32_0 = arith.constant 0 : i32
    %2 = arith.cmpi ne, %1, %c0_i32_0 : i32
    scf.if %2 {
      %cst_30 = arith.constant 0.000000e+00 : f32
      %39 = vector.broadcast %cst_30 : f32 to vector<1x1x128xf32>
      %c0_31 = arith.constant 0 : index
      %c0_32 = arith.constant 0 : index
      %c0_33 = arith.constant 0 : index
      %40 = vector.load %arg5[%c0_31, %c0_32, %c0_33] : memref<1x1x128xf32, #tpu.memory_space<vmem>>, vector<1x1x128xf32>
      tpu.vector_store %arg5[%c0_31, %c0_32, %c0_33], %39 {strides = array<i32>} : memref<1x1x128xf32, #tpu.memory_space<vmem>>, vector<1x1x128xf32>,
      %cst_34 = arith.constant 0.000000e+00 : f32
      %41 = vector.broadcast %cst_34 : f32 to vector<1x1x128xf32>
      %c0_35 = arith.constant 0 : index
      %c0_36 = arith.constant 0 : index
      %c0_37 = arith.constant 0 : index
      %42 = vector.load %arg6[%c0_35, %c0_36, %c0_37] : memref<1x1x128xf32, #tpu.memory_space<vmem>>, vector<1x1x128xf32>
      tpu.vector_store %arg6[%c0_35, %c0_36, %c0_37], %41 {strides = array<i32>} : memref<1x1x128xf32, #tpu.memory_space<vmem>>, vector<1x1x128xf32>,
      %cst_38 = arith.constant 0.000000e+00 : f32
      %43 = vector.broadcast %cst_38 : f32 to vector<1x1x128xf32>
      %c0_39 = arith.constant 0 : index
      %c0_40 = arith.constant 0 : index
      %c0_41 = arith.constant 0 : index
      %44 = vector.load %arg7[%c0_39, %c0_40, %c0_41] : memref<1x1x128xf32, #tpu.memory_space<vmem>>, vector<1x1x128xf32>
      tpu.vector_store %arg7[%c0_39, %c0_40, %c0_41], %43 {strides = array<i32>} : memref<1x1x128xf32, #tpu.memory_space<vmem>>, vector<1x1x128xf32>,
    } else {
    }
    %c0 = arith.constant 0 : index
    %c0_1 = arith.constant 0 : index
    %3 = vector.load %arg2[%c0, %c0_1] : memref<8x32xf32, #tpu.memory_space<vmem>>, vector<8x32xf32>
    %4 = vector.shape_cast %3 : vector<8x32xf32> to vector<1x8x32xf32>
    %cst = arith.constant dense<0.000000e+00> : vector<1xf32>
    %5 = vector.multi_reduction <add>, %4, %cst [1, 2] : vector<1x8x32xf32> to vector<1xf32>
    %6 = vector.shape_cast %5 : vector<1xf32> to vector<1x1x1xf32>
    %7 = vector.extract %6[0, 0, 0] : f32 from vector<1x1x1xf32>
    %c0_2 = arith.constant 0 : index
    %c0_3 = arith.constant 0 : index
    %8 = vector.load %arg3[%c0_2, %c0_3] : memref<32x32xf32, #tpu.memory_space<vmem>>, vector<32x32xf32>
    %cst_4 = arith.constant dense<0.000000e+00> : vector<32xf32>
    %9 = vector.multi_reduction <add>, %8, %cst_4 [1] : vector<32x32xf32> to vector<32xf32>
    %10 = vector.shape_cast %9 : vector<32xf32> to vector<32x1xf32>
    %c0_5 = arith.constant 0 : index
    %c0_6 = arith.constant 0 : index
    %11 = vector.load %arg4[%c0_5, %c0_6] : memref<32x16xf32, #tpu.memory_space<vmem>>, vector<32x16xf32>
    %cst_7 = arith.constant dense<0.000000e+00> : vector<32xf32>
    %12 = vector.multi_reduction <add>, %11, %cst_7 [1] : vector<32x16xf32> to vector<32xf32>
    %13 = vector.shape_cast %12 : vector<32xf32> to vector<32x1xf32>
    %14 = arith.mulf %10, %13 : vector<32x1xf32>
    %15 = vector.shape_cast %14 : vector<32x1xf32> to vector<1x32x1xf32>
    %cst_8 = arith.constant dense<0.000000e+00> : vector<1xf32>
    %16 = vector.multi_reduction <add>, %15, %cst_8 [1, 2] : vector<1x32x1xf32> to vector<1xf32>
    %17 = vector.shape_cast %16 : vector<1xf32> to vector<1x1x1xf32>
    %18 = vector.extract %17[0, 0, 0] : f32 from vector<1x1x1xf32>
    %cst_9 = arith.constant 1.000000e-01 : f32
    %19 = vector.broadcast %cst_9 : f32 to vector<32x16xf32>
    %20 = arith.subf %19, %11 : vector<32x16xf32>
    %cst_10 = arith.constant 0.000000e+00 : f32
    %21 = vector.broadcast %cst_10 : f32 to vector<32x16xf32>
    %22 = arith.maximumf %20, %21 : vector<32x16xf32>
    %23 = vector.shape_cast %22 : vector<32x16xf32> to vector<1x32x16xf32>
    %cst_11 = arith.constant dense<0.000000e+00> : vector<1xf32>
    %24 = vector.multi_reduction <add>, %23, %cst_11 [1, 2] : vector<1x32x16xf32> to vector<1xf32>
    %25 = vector.shape_cast %24 : vector<1xf32> to vector<1x1x1xf32>
    %26 = vector.extract %25[0, 0, 0] : f32 from vector<1x1x1xf32>
    %c0_12 = arith.constant 0 : index
    %c0_13 = arith.constant 0 : index
    %c0_14 = arith.constant 0 : index
    %27 = vector.load %arg5[%c0_12, %c0_13, %c0_14] : memref<1x1x128xf32, #tpu.memory_space<vmem>>, vector<1x1x128xf32>
    %28 = vector.broadcast %7 : f32 to vector<1x1x128xf32>
    %29 = arith.addf %27, %28 : vector<1x1x128xf32>
    %c0_15 = arith.constant 0 : index
    %c0_16 = arith.constant 0 : index
    %c0_17 = arith.constant 0 : index
    %30 = vector.load %arg5[%c0_15, %c0_16, %c0_17] : memref<1x1x128xf32, #tpu.memory_space<vmem>>, vector<1x1x128xf32>
    tpu.vector_store %arg5[%c0_15, %c0_16, %c0_17], %29 {strides = array<i32>} : memref<1x1x128xf32, #tpu.memory_space<vmem>>, vector<1x1x128xf32>,
    %c0_18 = arith.constant 0 : index
    %c0_19 = arith.constant 0 : index
    %c0_20 = arith.constant 0 : index
    %31 = vector.load %arg6[%c0_18, %c0_19, %c0_20] : memref<1x1x128xf32, #tpu.memory_space<vmem>>, vector<1x1x128xf32>
    %32 = vector.broadcast %18 : f32 to vector<1x1x128xf32>
    %33 = arith.addf %31, %32 : vector<1x1x128xf32>
    %c0_21 = arith.constant 0 : index
    %c0_22 = arith.constant 0 : index
    %c0_23 = arith.constant 0 : index
    %34 = vector.load %arg6[%c0_21, %c0_22, %c0_23] : memref<1x1x128xf32, #tpu.memory_space<vmem>>, vector<1x1x128xf32>
    tpu.vector_store %arg6[%c0_21, %c0_22, %c0_23], %33 {strides = array<i32>} : memref<1x1x128xf32, #tpu.memory_space<vmem>>, vector<1x1x128xf32>,
    %c0_24 = arith.constant 0 : index
    %c0_25 = arith.constant 0 : index
    %c0_26 = arith.constant 0 : index
    %35 = vector.load %arg7[%c0_24, %c0_25, %c0_26] : memref<1x1x128xf32, #tpu.memory_space<vmem>>, vector<1x1x128xf32>
    %36 = vector.broadcast %26 : f32 to vector<1x1x128xf32>
    %37 = arith.addf %35, %36 : vector<1x1x128xf32>
    %c0_27 = arith.constant 0 : index
    %c0_28 = arith.constant 0 : index
    %c0_29 = arith.constant 0 : index
    %38 = vector.load %arg7[%c0_27, %c0_28, %c0_29] : memref<1x1x128xf32, #tpu.memory_space<vmem>>, vector<1x1x128xf32>
    tpu.vector_store %arg7[%c0_27, %c0_28, %c0_29], %37 {strides = array<i32>} : memref<1x1x128xf32, #tpu.memory_space<vmem>>, vector<1x1x128xf32>,
    return
  }
  func.func @transform_0(%arg0: i32, %arg1: i32) -> (i32, i32) {
    %c2_i32 = arith.constant 2 : i32
    %0 = arith.muli %arg0, %c2_i32 : i32
    %1 = arith.addi %0, %arg1 : i32
    %c0_i32 = arith.constant 0 : i32
    %c0_i32_0 = arith.constant 0 : i32
    return %1, %c0_i32 : i32, i32
  }
  func.func @transform_1(%arg0: i32, %arg1: i32) -> (i32, i32) {
    %c2_i32 = arith.constant 2 : i32
    %0 = arith.muli %arg0, %c2_i32 : i32
    %1 = arith.addi %0, %arg1 : i32
    %c0_i32 = arith.constant 0 : i32
    %c0_i32_0 = arith.constant 0 : i32
    return %1, %c0_i32 : i32, i32
  }
  func.func @transform_2(%arg0: i32, %arg1: i32) -> (i32, i32) {
    %c2_i32 = arith.constant 2 : i32
    %0 = arith.muli %arg0, %c2_i32 : i32
    %1 = arith.addi %0, %arg1 : i32
    %c0_i32 = arith.constant 0 : i32
    %c0_i32_0 = arith.constant 0 : i32
    return %1, %c0_i32 : i32, i32
  }
  func.func @transform_3(%arg0: i32, %arg1: i32) -> (i32, i32, i32) {
    %c0_i32 = arith.constant 0 : i32
    %c0_i32_0 = arith.constant 0 : i32
    %c0_i32_1 = arith.constant 0 : i32
    return %arg0, %c0_i32, %c0_i32_0 : i32, i32, i32
  }
  func.func @transform_4(%arg0: i32, %arg1: i32) -> (i32, i32, i32) {
    %c0_i32 = arith.constant 0 : i32
    %c0_i32_0 = arith.constant 0 : i32
    %c0_i32_1 = arith.constant 0 : i32
    return %arg0, %c0_i32, %c0_i32_0 : i32, i32, i32
  }
  func.func @transform_5(%arg0: i32, %arg1: i32) -> (i32, i32, i32) {
    %c0_i32 = arith.constant 0 : i32
    %c0_i32_0 = arith.constant 0 : i32
    %c0_i32_1 = arith.constant 0 : i32
    return %arg0, %c0_i32, %c0_i32_0 : i32, i32, i32
  }
}

</mosaic_0001>

<bundles_post_ra>
// kernel: tpu_custom_call.1
= control target key start
LH: loop header
LB: loop body
LE: loop exit
PB: predicated region body
PF: predicated region fallthrough
CT: control target
= control target key end

     0   :  { %11 = vsyncpa [#allocation3], 0  ;;  %s1181_s0 = inlined_call_operand.vmem [shape: f32[32,32], index: 0, kind: input, shape index: {}]   ;;  %s1182_s1 = inlined_call_operand.vmem [shape: f32[128,32], index: 1, kind: input, shape index: {}]   ;;  %s1183_s2 = inlined_call_operand.vmem [shape: f32[128,16], index: 2, kind: input, shape index: {}]   ;;  %s1184_s3 = inlined_call_operand.hbm [shape: f32[2,1,128], index: 3, kind: output, shape index: {0}]   ;;  %s1185_s4 = inlined_call_operand.hbm [shape: f32[2,1,128], index: 4, kind: output, shape index: {1}]   ;;  %s1186_s5 = inlined_call_operand.hbm [shape: f32[2,1,128], index: 5, kind: output, shape index: {2}]  }
   0x1   :  { %13 = vsyncpa [#allocation3 + $0x1], 0 }
   0x2   :  { %14 = vsyncpa [#allocation5], 0 }
   0x3   :  { %16 = vsyncpa [#allocation5 + $0x1], 0  ;;  %s929_s18 = smov 0   ;;  %s931_s19 = smov 0  }
   0x4   :  { %s933_s20 = smov 0   ;;  %s935_s21 = smov 0  }
   0x5   :  { %s937_s22 = smov 0   ;;  %s939_s23 = smov 0  }
   0x6   :  { %s941_s24 = smov 0   ;;  %s943_s25 = smov 0  }
   0x7 LB: > { %1192 = sst [smem:[#allocation9_spill]] %s885_s23  ;;  %s1188_s26 = sadd.s32 4294967295, %s893_s25   ;;  %s893_s25 = sphi %s943_s25, %s22_s25   ;;  %s889_s24 = sphi %s941_s24, %s1203_s24   ;;  %s885_s23 = sphi %s939_s23, %s1202_s23   ;;  %s881_s22 = sphi %s937_s22, %s1201_s22   ;;  %s877_s21 = sphi %s935_s21, %s1200_s21   ;;  %s873_s20 = sphi %s933_s20, %s1206_s20   ;;  %s869_s19 = sphi %s931_s19, %s1205_s19   ;;  %s865_s18 = sphi %s929_s18, %s1204_s18  }
   0x8   : > { %1193 = sst [smem:[#allocation10_spill]] %s889_s24  ;;  %s1187_s27 = sadd.s32 4294967294, %s893_s25  }
   0x9   : > { %s31_s28 = sadd.s32 1, %s885_s23  ;;  %s34_s29 = sadd.s32 1, %s889_s24 }
   0xa   : > { %p32_p0 = scmp.ge.s32.totalorder %s31_s28, 2  ;;  %p141_p1 = scmp.ne.s32.totalorder %s873_s20, %s869_s19 }
   0xb   : > { %p142_p2 = scmp.eq.s32.totalorder %s1188_s26, 3  ;;  %p147_p4 = scmp.ne.s32.totalorder %s869_s19, %s865_s18 }
   0xc   : > { %s1208_s28 = smov (%p32_p0, %s31_s28), 0  ;;  %s1210_s29 = smov (!%p32_p0, %s34_s29), %s889_s24 }
   0xd   : > { %1194 = sst [smem:[#allocation11_spill]] %s1208_s28  ;;  %p980_p3 = por %p142_p2, %p141_p1 }
   0xe   : > { %p36_p5 = scmp.ge.s32.totalorder %s1210_s29, 2  ;;  %p148_p6 = scmp.eq.s32.totalorder %s1187_s27, 3 }
   0xf   : > { %p642_p7 = scmp.ge.s32.totalorder %s893_s25, 1  ;;  %p255_p8 = scmp.lt.s32.totalorder %s893_s25, 5 }
  0x10   : > { %s1212_s29 = smov (%p36_p5, %s1210_s29), 0  ;;  %p992_p9 = por %p148_p6, %p147_p4 }
  0x11   : > { %1196 = sst [smem:[#allocation12_spill]] %s1212_s29  ;;  %p256_p10 = pnand %p642_p7, %p255_p8 }
  0x12   : > { %s128_s7 = ssub.s32 %s889_s24, %s1212_s29  ;;  %s131_s8 = sadd.s32 1, %s873_s20 }
  0x13   : > { %p129_p11 = scmp.eq.s32.totalorder %s128_s7, 0  ;;  %259 = sbr.rel (%p256_p10) target bundleno = 435 (0x1b3), region = 32 }
  0x14   : > { %s1003_s10 = sand.u32 (!%p256_p10), 1, %s869_s19   ;;  %s643_s11 = sshll.u32 (!%p256_p10), %s881_s22, 1 }
  0x15   : > { %s1000_s9 = scalar_select %p129_p11, %s873_s20, %s131_s8  }
  0x16   : > { %s306_s12 = sadd.s32 (!%p256_p10), %s877_s21, %s643_s11  ;;  %s1023_s24 = scalar_lea.vmem (!%p256_p10), [#allocation2], %s1003_s10 }
  0x17   : > { %p307_p12 = scmp.lt.s32.totalorder (!%p256_p10), %s306_s12, 3  ;;  %s646_s13 = sshll.u32 (!%p256_p10), %s306_s12, 2 }
  0x18   : > { %p316_p13 = scmp.lt.s32.totalorder %s646_s13, 15  ;;  %s1026_s23 = scalar_lea.vmem [#allocation4], %s1003_s10 }
  0x19   : > { %s1214_s12 = smov (!%p307_p12, %s306_s12), 3  ;;  %p651_p0 = scmp.ne.s32.totalorder %s877_s21, 0 }
  0x1a   : > { %s1216_s13 = smov (!%p316_p13, %s646_s13), 15  ;;  %s644_s14 = sshll.u32 %s1214_s12, 3 }
  0x1b   : > { %s1010_s17 = scalar_lea.vmem %s1181_s0, %s644_s14  ;;  %s647_s7 = sshll.u32 %s1216_s13, 3 }
  0x1c   : > { %s1015_s26 = scalar_lea.vmem %s1182_s1, %s647_s7  ;;  %s1020_s11 = scalar_lea.vmem %s1183_s2, %s647_s7 }
  0x1d   : > { %s1029_s12 = scalar_lea.vmem [#allocation6], %s1003_s10  ;;  %336 = sbr.rel (%p651_p0) target bundleno = 37 (0x25), region = 36 }
  0x22   : > { %v895_v0 = vmov 0.0  }
  0x23   : > { %337 = vst [vmem:[%s1023_s24] sm:$0x1] %v895_v0  ;;  %338 = vst [vmem:[%s1026_s23] sm:$0x1] %v895_v0 }
  0x24   : > { %339 = vst [vmem:[%s1029_s12] sm:$0x1] %v895_v0 }
  0x25 PF: > { %v368_v1 = vld [vmem:[%s1020_s11] sm:$0xff]  ;;  %vm372_vm0 = vcmask 130048   ;;  %vm341_vm1 = vcmask 261120   ;;  %v369_v3 = vld [vmem:[%s1020_s11 + $0x8] sm:$0xff]  ;;  %v370_v9 = vld [vmem:[%s1020_s11 + $0x10] sm:$0xff]  ;;  %vm389_vm2 = vcmask 7168  }
  0x26   : > { %v352_v2 = vld [vmem:[%s1015_s26] sm:$0xff]  ;;  %v373_v4 = vsel %vm372_vm0, %v368_v1, 0.0  ;;  %v353_v6 = vld [vmem:[%s1015_s26 + $0x8] sm:$0xff]  ;;  %v376_v7 = vsel %vm372_vm0, %v369_v3, 0.0  ;;  %v354_v10 = vld [vmem:[%s1015_s26 + $0x10] sm:$0xff]  ;;  %v379_v13 = vsel %vm372_vm0, %v370_v9, 0.0 }
  0x27   : > { %v356_v5 = vsel %vm341_vm1, %v352_v2, 0.0  ;;  %374 = vadd.xlane.f32.xlu1 %v373_v4  ;;  %v359_v8 = vsel %vm341_vm1, %v353_v6, 0.0  ;;  %v406_v11 = vsub.f32 0.1, %v368_v1  ;;  %v407_v12 = vsub.f32 0.1, %v369_v3 }
  0x28   : > { %357 = vadd.xlane.f32.xlu0 %v356_v5  ;;  %v362_v14 = vsel %vm341_vm1, %v354_v10, 0.0  ;;  %v371_v15 = vld [vmem:[%s1020_s11 + $0x18] sm:$0xff]  ;;  %v408_v19 = vsub.f32 0.1, %v370_v9  ;;  %v340_v27 = vld [vmem:[%s1010_s17] sm:$0xff]  ;;  %s463_s13 = sshll.u32 %s1023_s24, 4  ;;  %s464_s13 = int_to_ptr.vmem [resolvable:$true] %s463_s13 }
  0x29   : > { %v355_v16 = vld [vmem:[%s1015_s26 + $0x18] sm:$0xff]  ;;  %v410_v17 = vmax.f32 %v406_v11, 0.0  ;;  %v411_v18 = vmax.f32 %v407_v12, 0.0  ;;  %v382_v20 = vsel %vm372_vm0, %v371_v15, 0.0  ;;  %v409_v22 = vsub.f32 0.1, %v371_v15 }
  0x2a   : > { %v365_v21 = vsel %vm341_vm1, %v355_v16, 0.0  ;;  %v412_v25 = vmax.f32 %v408_v19, 0.0  ;;  %v342_v29 = vsel %vm341_vm1, %v340_v27, 0.0  ;;  %v430_v60 = vld [vmem:[%s1023_s24] sm:$0x1]  ;;  %s1060_s26 = sshll.u32 %s881_s22, 4 }
  0x2b   : > { %377 = vadd.xlane.f32.xlu1 %v376_v7  ;;  %v414_v23 = vsel %vm372_vm0, %v410_v17, 0.0  ;;  %v415_v24 = vsel %vm372_vm0, %v411_v18, 0.0  ;;  %v413_v26 = vmax.f32 %v409_v22, 0.0  ;;  %s461_s29 = scalar_lea.hbm %s1184_s3, %s1060_s26  ;;  %s443_s14 = scalar_lea.sflag [#allocation3], %s1003_s10 }
  0x2c   : > { %360 = vadd.xlane.f32.xlu0 %v359_v8  ;;  %v416_v28 = vadd.f32 %v415_v24, %v414_v23  ;;  %v417_v30 = vsel %vm372_vm0, %v412_v25, 0.0  ;;  %s745_s15 = scalar_lea.vmem %s464_s13, 16  ;;  %s896_s16 = smov [#allocation2]  }
  0x2d   : > { %v419_v32 = vsel %vm372_vm0, %v413_v26, 0.0  ;;  %p746_p1 = scmp.ne.s32.totalorder %s464_s13, %s745_s15  ;;  %s749_s17 = sshll.u32 %s896_s16, 4  ;;  %s750_s17 = int_to_ptr.vmem [resolvable:$false] %s749_s17 }
  0x2e   : > { %v418_v31 = vadd.f32 %v417_v30, %v416_v28  ;;  %s751_s7 = scalar_lea.vmem %s750_s17, 32  ;;  %p752_p5 = scmp.lt.s32.totalorder %s464_s13, %s750_s17 }
  0x2f   : > { %380 = vadd.xlane.f32.xlu1 %v379_v13  ;;  %p747_p2 = pnand %p746_p1, %p980_p3  ;;  %p753_p6 = scmp.lt.s32.totalorder %s751_s7, %s745_s15 }
  0x30   : > { %363 = vadd.xlane.f32.xlu0 %v362_v14  ;;  %v420_v33 = vadd.f32 %v419_v32, %v418_v31 }
  0x31   : > { %p748_p4 = pneg %p747_p2  ;;  %p754_p7 = por %p753_p6, %p752_p5 }
  0x33   : > { %383 = vadd.xlane.f32.xlu1 %v382_v20  ;;  %p755_p8 = pnand %p754_p7, %p748_p4 }
  0x34   : > { %366 = vadd.xlane.f32.xlu0 %v365_v21 }
  0x38   : > { %343 = vadd.xlane.f32.xlu0 %v342_v29 }
  0x3c   : > { %421 = vadd.xlane.f32.xlu0 %v420_v33 }
  0xb0   : > { %v375_v34 = vpop.xlane.xlu1 %374 }
  0xb1   : > { %v358_v35 = vpop.xlane.xlu0 %357 }
  0xb2   : > { %v385_v39 = vmul.f32 %v375_v34, %v358_v35 }
  0xb4   : > { %v378_v36 = vpop.xlane.xlu1 %377  ;;  %v390_v44 = vsel %vm389_vm2, %v385_v39, 0.0 }
  0xb5   : > { %v361_v37 = vpop.xlane.xlu0 %360 }
  0xb6   : > { %v386_v38 = vmul.f32 %v378_v36, %v361_v37 }
  0xb8   : > { %v381_v40 = vpop.xlane.xlu1 %380  ;;  %v391_v42 = vsel %vm389_vm2, %v386_v38, 0.0 }
  0xb9   : > { %v364_v41 = vpop.xlane.xlu0 %363  ;;  %v392_v46 = vadd.f32 %v391_v42, %v390_v44 }
  0xba   : > { %v387_v43 = vmul.f32 %v381_v40, %v364_v41 }
  0xbc   : > { %v393_v45 = vsel %vm389_vm2, %v387_v43, 0.0  ;;  %v384_v47 = vpop.xlane.xlu1 %383 }
  0xbd   : > { %v367_v48 = vpop.xlane.xlu0 %366  ;;  %v394_v50 = vadd.f32 %v393_v45, %v392_v46 }
  0xbe   : > { %v388_v49 = vmul.f32 %v384_v47, %v367_v48 }
  0xc0   : > { %v395_v51 = vsel %vm389_vm2, %v388_v49, 0.0 }
  0xc1   : > { %v396_v52 = vadd.f32 %v395_v51, %v394_v50  ;;  %v344_v53 = vpop.xlane.xlu0 %343 }
  0xc2   : > { %v345_v54 = vrot.slane %v344_v53, 4 }
  0xc3   : > { %397 = vadd.xlane.f32.xlu1 %v396_v52 }
  0xc4   : > { %v346_v55 = vadd.f32 %v345_v54, %v344_v53 }
  0xc6   : > { %v347_v56 = vrot.slane %v346_v55, 2 }
  0xc8   : > { %v348_v57 = vadd.f32 %v347_v56, %v346_v55 }
  0xca   : > { %v349_v58 = vrot.slane %v348_v57, 1 }
  0xcc   : > { %v350_v59 = vadd.f32 %v349_v58, %v348_v57 }
  0xce   : > { %657 = vpush %v350_v59 }
  0xff   : > { %s658_s21 = spop %657 }
 0x100   : > { %v431_v61 = vstv %s658_s21 }
 0x101   : > { %v432_v62 = vadd.f32 %v431_v61, %v430_v60 }
 0x103   : > { %433 = vst [vmem:[%s1023_s24] sm:$0x1] %v432_v62 }
 0x104   : > { %758 = shalt.err (!%p755_p8)
}
 0x105   : > { %s759_s22 = scalar_lea.hbm %s461_s29, 16  ;;  %s763_s8 = scalar_lea.hbm %s1184_s3, 32 }
 0x106   : > { %p760_p10 = scmp.ne.s32.totalorder %s461_s29, %s759_s22  ;;  %p764_p13 = scmp.lt.s32.totalorder %s461_s29, %s1184_s3 }
 0x107   : > { %p765_p0 = scmp.lt.s32.totalorder %s763_s8, %s759_s22 }
 0x108   : > { %p761_p11 = pnand %p760_p10, %p980_p3 }
 0x109   : > { %p766_p1 = por %p765_p0, %p764_p13 }
 0x10a   : > { %p762_p12 = pneg %p761_p11 }
 0x10c   : > { %p767_p2 = pnand %p766_p1, %p762_p12 }
 0x10e   : > { %770 = shalt.err (!%p767_p2)
}
 0x10f   : > { %663 = dma.vmem_to_hbm [thread:$0]  (%p980_p3), %s464_s13, 16, %s461_s29, %s443_s14   ;;  %v422_v63 = vpop.xlane.xlu0 %421  ;;  %v434_v13 = vld [vmem:[%s1026_s23] sm:$0x1] }
 0x110   : > { %v423_v0 = vrot.slane %v422_v63, 4  ;;  %s1198_s27 = sadd.s32 4294967295, %s893_s25   ;;  %s476_s29 = sshll.u32 %s1026_s23, 4  ;;  %v438_v14 = vld [vmem:[%s1029_s12] sm:$0x1]  ;;  %s1094_s29 = int_to_ptr.vmem [resolvable:$true] %s476_s29 }
 0x111   : > { %s1082_s28 = sand.u32 1, %s1198_s27   ;;  %s489_s14 = sshll.u32 %s1029_s12, 4  ;;  %s1102_s14 = int_to_ptr.vmem [resolvable:$true] %s489_s14 }
 0x112   : > { %v424_v1 = vadd.f32 %v423_v0, %v422_v63  ;;  %s1092_s7 = scalar_lea.hbm %s1185_s4, %s1060_s26  ;;  %s1100_s10 = scalar_lea.hbm %s1186_s5, %s1060_s26 }
 0x113   : > { %s447_s8 = scalar_lea.sflag [#allocation5], %s1082_s28  ;;  %s771_s11 = scalar_lea.vmem %s1094_s29, 16 }
 0x114   : > { %v425_v2 = vrot.slane %v424_v1, 2  ;;  %p772_p4 = scmp.ne.s32.totalorder %s1094_s29, %s771_s11  ;;  %s897_s21 = smov [#allocation4]  }
 0x115   : > { %s775_s27 = sshll.u32 %s897_s21, 4  ;;  %s776_s27 = int_to_ptr.vmem [resolvable:$false] %s775_s27 }
 0x116   : > { %v426_v6 = vadd.f32 %v425_v2, %v424_v1  ;;  %p773_p5 = pnand %p772_p4, %p980_p3  ;;  %p778_p7 = scmp.lt.s32.totalorder %s1094_s29, %s776_s27 }
 0x118   : > { %v427_v9 = vrot.slane %v426_v6, 1  ;;  %p774_p6 = pneg %p773_p5 }
 0x11a   : > { %v428_v12 = vadd.f32 %v427_v9, %v426_v6 }
 0x14c   : > { %v398_v3 = vpop.xlane.xlu1 %397 }
 0x14d   : > { %v399_v4 = vrot.slane %v398_v3, 4 }
 0x14f   : > { %v400_v5 = vadd.f32 %v399_v4, %v398_v3 }
 0x151   : > { %v401_v7 = vrot.slane %v400_v5, 2 }
 0x153   : > { %v402_v8 = vadd.f32 %v401_v7, %v400_v5 }
 0x155   : > { %v403_v10 = vrot.slane %v402_v8, 1 }
 0x157   : > { %v404_v11 = vadd.f32 %v403_v10, %v402_v8 }
 0x159   : > { %659 = vpush %v404_v11 }
 0x15a   : > { %661 = vpush %v428_v12 }
 0x18a   : > { %s660_s13 = spop %659 }
 0x18b   : > { %v435_v15 = vstv %s660_s13  ;;  %s662_s15 = spop %661  ;;  %s777_s13 = scalar_lea.vmem %s776_s27, 32 }
 0x18c   : > { %v436_v16 = vadd.f32 %v435_v15, %v434_v13  ;;  %v439_v17 = vstv %s662_s15  ;;  %p779_p8 = scmp.lt.s32.totalorder %s777_s13, %s771_s11 }
 0x18d   : > { %v440_v18 = vadd.f32 %v439_v17, %v438_v14 }
 0x18e   : > { %437 = vst [vmem:[%s1026_s23] sm:$0x1] %v436_v16  ;;  %p780_p10 = por %p779_p8, %p778_p7 }
 0x18f   : > { %441 = vst [vmem:[%s1029_s12] sm:$0x1] %v440_v18 }
 0x190   : > { %p781_p11 = pnand %p780_p10, %p774_p6 }
 0x192   : > { %784 = shalt.err (!%p781_p11)
}
 0x193   : > { %s785_s23 = scalar_lea.hbm %s1092_s7, 16  ;;  %s789_s15 = scalar_lea.hbm %s1185_s4, 32 }
 0x194   : > { %p786_p12 = scmp.ne.s32.totalorder %s1092_s7, %s785_s23  ;;  %p790_p1 = scmp.lt.s32.totalorder %s1092_s7, %s1185_s4 }
 0x195   : > { %p791_p2 = scmp.lt.s32.totalorder %s789_s15, %s785_s23 }
 0x196   : > { %p787_p13 = pnand %p786_p12, %p980_p3 }
 0x197   : > { %p792_p4 = por %p791_p2, %p790_p1 }
 0x198   : > { %p788_p0 = pneg %p787_p13 }
 0x19a   : > { %p793_p5 = pnand %p792_p4, %p788_p0 }
 0x19c   : > { %796 = shalt.err (!%p793_p5)
}
 0x19d   : > { %664 = dma.vmem_to_hbm [thread:$0]  (%p980_p3), %s1094_s29, 16, %s1092_s7, %s447_s8  }
 0x19e   : > { %s797_s22 = scalar_lea.vmem %s1102_s14, 16  ;;  %s898_s24 = smov [#allocation6]  }
 0x19f   : > { %p798_p6 = scmp.ne.s32.totalorder %s1102_s14, %s797_s22  ;;  %s801_s11 = sshll.u32 %s898_s24, 4  ;;  %s802_s11 = int_to_ptr.vmem [resolvable:$false] %s801_s11 }
 0x1a0   : > { %s803_s21 = scalar_lea.vmem %s802_s11, 32  ;;  %p804_p10 = scmp.lt.s32.totalorder %s1102_s14, %s802_s11 }
 0x1a1   : > { %p799_p7 = pnand %p798_p6, %p980_p3  ;;  %p805_p11 = scmp.lt.s32.totalorder %s803_s21, %s797_s22 }
 0x1a3   : > { %p800_p8 = pneg %p799_p7  ;;  %p806_p12 = por %p805_p11, %p804_p10 }
 0x1a5   : > { %p807_p13 = pnand %p806_p12, %p800_p8 }
 0x1a7   : > { %810 = shalt.err (!%p807_p13)
}
 0x1a8   : > { %s811_s27 = scalar_lea.hbm %s1100_s10, 16  ;;  %s815_s13 = scalar_lea.hbm %s1186_s5, 32 }
 0x1a9   : > { %p812_p0 = scmp.ne.s32.totalorder %s1100_s10, %s811_s27  ;;  %p816_p4 = scmp.lt.s32.totalorder %s1100_s10, %s1186_s5 }
 0x1aa   : > { %p817_p5 = scmp.lt.s32.totalorder %s815_s13, %s811_s27 }
 0x1ab   : > { %p813_p1 = pnand %p812_p0, %p980_p3 }
 0x1ac   : > { %p818_p6 = por %p817_p5, %p816_p4 }
 0x1ad   : > { %p814_p2 = pneg %p813_p1 }
 0x1af   : > { %p819_p7 = pnand %p818_p6, %p814_p2 }
 0x1b1   : > { %822 = shalt.err (!%p819_p7)
}
 0x1b2   : > { %665 = dma.vmem_to_hbm [thread:$0]  (%p980_p3), %s1102_s14, 16, %s1100_s10, %s447_s8  }
 0x1b3 PF: > { %p679_p8 = scmp.ge.s32.totalorder %s893_s25, 2  ;;  %s501_s26 = sand.u32 1, %s865_s18  }
 0x1b4   : > { %s502_s15 = scalar_lea.sflag [#allocation3], %s501_s26 }
 0x1b5   : > { %p670_p10 = pnand %p679_p8, %p992_p9 }
 0x1b7   : > { %p671_p11 = pneg %p670_p10 }
 0x1b9   : > { %856 = dma.done.wait (%p671_p11), %s502_s15, 16  }
 0x1ba   : > { %858 = vsyncadd (%p671_p11), %s502_s15, 4294967280  ;;  %s1199_s16 = sadd.s32 4294967294, %s893_s25  }
 0x1bb   : > { %s509_s30 = sand.u32 1, %s1199_s16  }
 0x1bc   : > { %s510_s17 = scalar_lea.sflag [#allocation5], %s509_s30 }
 0x1bd   : > { %860 = dma.done.wait (%p671_p11), %s510_s17, 32  }
 0x1be   : > { %862 = vsyncadd (%p671_p11), %s510_s17, 4294967264  ;;  %s22_s25 = sadd.s32 1, %s893_s25   ;;  %s1200_s21 = sld [smem:[#allocation9_spill]] }
 0x1bf   : > { %p19_p3 = scmp.ge.s32.totalorder %s22_s25, 6   ;;  %s1201_s22 = sld [smem:[#allocation10_spill]] }
 0x1c0   : > { %s1202_s23 = sld [smem:[#allocation11_spill]]  ;;  %s1204_s18 = smov %s869_s19 }
 0x1c1   : > { %s1203_s24 = sld [smem:[#allocation12_spill]]  ;;  %s1205_s19 = smov %s873_s20 }
 0x1c2   : > { %s1206_s20 = smov %s1000_s9  ;;  %21 = sbr.rel (!%p19_p3) target bundleno = 7 (0x7), region = 109 }
 0x1c7   :  { %522 = vsyncpa [#allocation3], 1 }
 0x1c8   :  { %524 = vsyncpa [#allocation3 + $0x1], 1 }
 0x1c9   :  { %525 = vsyncpa [#allocation5], 1 }
 0x1ca   :  { %527 = vsyncpa [#allocation5 + $0x1], 1 }

</bundles_post_ra>
